<compile_context>
chip_gen: v5e
topology: v5e:2x2
jax: 0.10.0
libtpu: 0.0.40
codegen_flags: <defaults>
</compile_context>

<pallas_src>
import math
import functools

import numpy as np
import jax
import jax.numpy as jnp
from jax.experimental import pallas as pl
from jax.experimental.pallas import tpu as pltpu


def func_n(w, j):
    li = [w]
    while w != 1:
        w = w // 2
        li.append(w)
    li.reverse()
    return li[j]


def _round_up(x, m):
    return ((x + m - 1) // m) * m


def _skipgram_kernel(nj_ref, widx_ref, mults_ref, phi_ref, rows_ref, out_ref, *,
                     samples_per_step):
    """Hierarchical-softmax path probability for `samples_per_step` samples per grid step.

    nj_ref   : SMEM (B_pad,) int32            node_j per sample
    widx_ref : SMEM (B_pad,) int32            leaf index w = num_nodes + node_k per sample
    mults_ref: VMEM (S, p_pad, 1) f32         +1 / -1 per path slot, 0.0 == padding
    phi_ref  : VMEM (num_nodes, 1, E_pad)     embedding table (VMEM-resident, fetched once)
    rows_ref : VMEM (2N, p_pad, E_pad)        path-major gathered prob_tensor rows (resident)
    out_ref  : VMEM (S, 128) f32              probability per sample (read lane 0)
    """
    S = samples_per_step
    base = pl.program_id(0) * S
    result_rows = []
    for s in range(S):                                   # static unroll; S is small
        j = nj_ref[base + s]
        w = widx_ref[base + s]
        h = phi_ref[j]                                   # (1, E_pad)      one VMEM row
        rows = rows_ref[w]                               # (p_pad, E_pad)  whole ancestor path
        mv = mults_ref[s]                                # (p_pad, 1)
        # exact f32 dot products (padded lanes are zero and contribute nothing)
        d = jnp.sum(rows * h, axis=-1, keepdims=True)    # (p_pad, 1)
        x = mv * d
        # stable log-sigmoid: log(sigmoid(x)) = min(x, 0) - log(1 + exp(-|x|))
        log_sig = jnp.minimum(x, 0.0) - jnp.log(1.0 + jnp.exp(-jnp.abs(x)))
        log_f = jnp.where(mv != 0.0, log_sig, jnp.zeros_like(log_sig))
        p = jnp.exp(jnp.sum(log_f, keepdims=True))       # (1, 1) == prod(sigmoid)
        result_rows.append(jnp.broadcast_to(p, (1, 128)))
    out_ref[...] = jnp.concatenate(result_rows, axis=0).astype(out_ref.dtype)


class SimpleSkipGramPallas:
    def __init__(self, num_nodes, embedding_size, window_size, key, samples_per_step=8):
        self.window_size = window_size
        self.num_nodes = num_nodes
        self.embedding_size = embedding_size
        self.emb_pad = max(128, _round_up(embedding_size, 128))
        self.S = max(8, _round_up(samples_per_step, 8))

        k1, k2 = jax.random.split(key)
        # torch.rand -> U[0, 1) float32 parameters
        self.phi = jax.random.uniform(k1, (num_nodes, embedding_size), jnp.float32)
        self.prob_tensor = jax.random.uniform(k2, (2 * num_nodes, embedding_size), jnp.float32)

        # ---- path-major tables, built once at init (mirrors torch's host-side path walk) ----
        p_max = 1
        for w in range(1, 2 * num_nodes):
            p_max = max(p_max, int(math.log(w, 2)) + 1 - 2)
        self.p_max = p_max
        self.p_pad = _round_up(p_max, 8)

        prob_np = np.asarray(self.prob_tensor, np.float32)
        phi_np = np.zeros((num_nodes, 1, self.emb_pad), np.float32)
        phi_np[:, 0, :embedding_size] = np.asarray(self.phi, np.float32)

        path_rows = np.zeros((2 * num_nodes, self.p_pad, self.emb_pad), np.float32)
        mult_table = np.zeros((2 * num_nodes, self.p_pad), np.float32)
        for w in range(1, 2 * num_nodes):
            length_path = int(math.log(w, 2)) + 1        # identical formula to the torch code
            for i in range(1, length_path - 1):
                mult = 1.0 if func_n(w, i + 1) == 2 * func_n(w, i) else -1.0
                path_rows[w, i - 1, :embedding_size] = prob_np[func_n(w, i)]
                mult_table[w, i - 1] = mult

        self._phi_dev = jnp.asarray(phi_np)
        self._path_rows_dev = jnp.asarray(path_rows)
        self._mult_table = mult_table

        # Both tables stay VMEM-resident for the whole call; budget explicitly.
        phi_bytes = num_nodes * 8 * self.emb_pad * 4          # (1, E) tile pads to 8 sublanes
        rows_bytes = 2 * num_nodes * self.p_pad * self.emb_pad * 4
        resident = phi_bytes + rows_bytes
        # TODO(synk): for large graphs (resident tables > ~12 MiB) switch to an HBM-resident
        # path-major table with a per-sample (p_pad, E_pad) DMA gather via scalar prefetch.
        assert 2 * resident + (2 << 20) <= 28 * 1024 * 1024, "tables too large for VMEM-resident path"
        self._vmem_limit = 32 * 1024 * 1024
        self._fns = {}                                        # compiled callable per num_steps

    def _get_fn(self, num_steps):
        fn = self._fns.get(num_steps)
        if fn is not None:
            return fn
        S, p_pad, e_pad = self.S, self.p_pad, self.emb_pad
        n, two_n = self.num_nodes, 2 * self.num_nodes
        kernel = functools.partial(_skipgram_kernel, samples_per_step=S)
        fn = jax.jit(pl.pallas_call(
            kernel,
            out_shape=jax.ShapeDtypeStruct((num_steps * S, 128), jnp.float32),
            grid=(num_steps,),
            in_specs=[
                pl.BlockSpec(memory_space=pltpu.MemorySpace.SMEM),          # node_j  (B_pad,)
                pl.BlockSpec(memory_space=pltpu.MemorySpace.SMEM),          # leaf w  (B_pad,)
                pl.BlockSpec((S, p_pad, 1), lambda i: (i, 0, 0)),           # mults
                pl.BlockSpec((n, 1, e_pad), lambda i: (0, 0, 0)),           # phi (VMEM-resident)
                pl.BlockSpec((two_n, p_pad, e_pad), lambda i: (0, 0, 0)),   # path rows (resident)
            ],
            out_specs=pl.BlockSpec((S, 128), lambda i: (i, 0)),
            compiler_params=pltpu.CompilerParams(
                dimension_semantics=("parallel",),       # shard batch steps across TCs on v7x
                vmem_limit_bytes=self._vmem_limit,
            ),
        ))
        self._fns[num_steps] = fn
        return fn

    def forward_batch(self, node_js, node_ks):
        node_js = [int(j) for j in node_js]
        node_ks = [int(k) for k in node_ks]
        batch = len(node_js)
        num_steps = max(1, -(-batch // self.S))
        b_pad = num_steps * self.S
        nj = np.zeros((b_pad,), np.int32)
        widx = np.zeros((b_pad,), np.int32)
        nj[:batch] = node_js
        widx[:batch] = [self.num_nodes + k for k in node_ks]
        mults = np.zeros((b_pad, self.p_pad, 1), np.float32)
        mults[:batch, :, 0] = self._mult_table[widx[:batch]]   # 0 rows for padded samples -> p=1
        out = self._get_fn(num_steps)(
            jnp.asarray(nj), jnp.asarray(widx), jnp.asarray(mults),
            self._phi_dev, self._path_rows_dev)
        return out[:batch, 0]                                  # (B,) probabilities

    def __call__(self, node_j, node_k):
        # TODO(synk): node_k -> tree-path resolution stays on host (mirrors torch's .item());
        # it is not traceable under jit/vmap over node_k, but the TPU kernel is compiled once
        # per padded batch size and reused for every (node_j, node_k).
        return self.forward_batch([int(node_j)], [int(node_k)])


def _reference(model, node_j, node_k):
    # Pure-JAX reference mirroring the PyTorch forward exactly.
    w = model.num_nodes + int(node_k)
    h = model.phi[int(node_j)]
    p = jnp.ones((1,), jnp.float32)
    length_path = int(math.log(w, 2)) + 1
    for i in range(1, length_path - 1):
        mult = 1.0 if func_n(w, i + 1) == 2 * func_n(w, i) else -1.0
        p = p * jax.nn.sigmoid(mult * jnp.dot(model.prob_tensor[func_n(w, i)], h))
    return p


if __name__ == "__main__":
    num_nodes, embedding_size, window_size = 16, 32, 2
    key = jax.random.PRNGKey(0)
    model = SimpleSkipGramPallas(num_nodes, embedding_size, window_size, key)

    # Single-sample path (matches torch forward: returns shape (1,))
    p1 = model(jnp.array(3, jnp.int32), jnp.array(5, jnp.int32))
    jax.block_until_ready(p1)
    ref1 = _reference(model, 3, 5)
    assert p1.shape == (1,) and p1.dtype == jnp.float32
    assert jnp.allclose(p1, ref1, atol=1e-5, rtol=1e-4), (p1, ref1)

    # Different node_k reuses the SAME compiled kernel (no per-path recompilation).
    p2 = model(jnp.array(7, jnp.int32), jnp.array(12, jnp.int32))
    jax.block_until_ready(p2)
    ref2 = _reference(model, 7, 12)
    assert jnp.allclose(p2, ref2, atol=1e-5, rtol=1e-4), (p2, ref2)

    # Batched path: 4 samples in one grid step (padded to S=8).
    node_js = [3, 0, 7, 12]
    node_ks = [5, 1, 9, 15]
    pb = model.forward_batch(node_js, node_ks)
    jax.block_until_ready(pb)
    refb = jnp.concatenate([_reference(model, j, k) for j, k in zip(node_js, node_ks)])
    assert pb.shape == (4,)
    assert jnp.allclose(pb, refb, atol=1e-5, rtol=1e-4), (pb, refb)

    # Larger batch spanning 2 grid steps (exercises grid > 1 and padding).
    node_js2 = [0, 1, 2, 3, 4, 5, 6, 7, 8, 9]
    node_ks2 = [15, 14, 13, 12, 11, 10, 9, 8, 7, 6]
    pb2 = model.forward_batch(node_js2, node_ks2)
    jax.block_until_ready(pb2)
    refb2 = jnp.concatenate([_reference(model, j, k) for j, k in zip(node_js2, node_ks2)])
    assert pb2.shape == (10,)
    assert jnp.allclose(pb2, refb2, atol=1e-5, rtol=1e-4), (pb2, refb2)

    print("KERNEL_OK")
</pallas_src>

<mosaic_0001>
module attributes {stable_mosaic.version = 11 : i64} {
  func.func @_skipgram_kernel(%arg0: i32, %arg1: memref<8xi32, #tpu.memory_space<smem>>, %arg2: memref<8xi32, #tpu.memory_space<smem>>, %arg3: memref<8x8x1xf32, #tpu.memory_space<vmem>>, %arg4: memref<16x1x128xf32, #tpu.memory_space<vmem>>, %arg5: memref<32x8x128xf32, #tpu.memory_space<vmem>>, %arg6: memref<8x128xf32, #tpu.memory_space<vmem>>) attributes {dimension_semantics = [#tpu.dimension_semantics<parallel>], iteration_bounds = array<i64: 1>, scalar_prefetch = 0 : i64, scratch_operands = 0 : i64, tpu.core_type = #tpu.core_type<tc>, window_params = [{transform_indices = @transform_0, window_bounds = array<i64: 8>}, {transform_indices = @transform_1, window_bounds = array<i64: 8>}, {transform_indices = @transform_2, window_bounds = array<i64: 8, 8, 1>}, {pipeline_mode = #tpu.pipeline_mode<synchronous>, transform_indices = @transform_3, window_bounds = array<i64: 16, 1, 128>}, {pipeline_mode = #tpu.pipeline_mode<synchronous>, transform_indices = @transform_4, window_bounds = array<i64: 32, 8, 128>}, {transform_indices = @transform_5, window_bounds = array<i64: 8, 128>}]} {
    %c8_i32 = arith.constant 8 : i32
    %0 = arith.muli %arg0, %c8_i32 : i32
    %c0_i32 = arith.constant 0 : i32
    %1 = arith.addi %0, %c0_i32 : i32
    %2 = arith.index_cast %1 : i32 to index
    %3 = memref.load %arg1[%2] : memref<8xi32, #tpu.memory_space<smem>>
    %c0_i32_0 = arith.constant 0 : i32
    %4 = arith.addi %0, %c0_i32_0 : i32
    %5 = arith.index_cast %4 : i32 to index
    %6 = memref.load %arg2[%5] : memref<8xi32, #tpu.memory_space<smem>>
    %7 = arith.index_cast %3 : i32 to index
    %c0 = arith.constant 0 : index
    %c0_1 = arith.constant 0 : index
    %8 = vector.load %arg4[%7, %c0, %c0_1] : memref<16x1x128xf32, #tpu.memory_space<vmem>>, vector<1x1x128xf32>
    %9 = vector.shape_cast %8 : vector<1x1x128xf32> to vector<1x128xf32>
    %10 = arith.index_cast %6 : i32 to index
    %c0_2 = arith.constant 0 : index
    %c0_3 = arith.constant 0 : index
    %11 = vector.load %arg5[%10, %c0_2, %c0_3] : memref<32x8x128xf32, #tpu.memory_space<vmem>>, vector<1x8x128xf32>
    %12 = vector.shape_cast %11 : vector<1x8x128xf32> to vector<8x128xf32>
    %c0_4 = arith.constant 0 : index
    %c0_5 = arith.constant 0 : index
    %c0_6 = arith.constant 0 : index
    %13 = vector.load %arg3[%c0_4, %c0_5, %c0_6] : memref<8x8x1xf32, #tpu.memory_space<vmem>>, vector<1x8x1xf32>
    %14 = vector.shape_cast %13 : vector<1x8x1xf32> to vector<8x1xf32>
    %15 = vector.broadcast %9 : vector<1x128xf32> to vector<8x128xf32>
    %16 = arith.mulf %12, %15 : vector<8x128xf32>
    %cst = arith.constant dense<0.000000e+00> : vector<8xf32>
    %17 = vector.multi_reduction <add>, %16, %cst [1] : vector<8x128xf32> to vector<8xf32>
    %18 = vector.shape_cast %17 : vector<8xf32> to vector<8x1xf32>
    %19 = arith.mulf %14, %18 : vector<8x1xf32>
    %cst_7 = arith.constant 0.000000e+00 : f32
    %20 = vector.broadcast %cst_7 : f32 to vector<8x1xf32>
    %21 = arith.minimumf %19, %20 : vector<8x1xf32>
    %22 = math.absf %19 : vector<8x1xf32>
    %cst_8 = arith.constant 0.000000e+00 : f32
    %23 = vector.broadcast %cst_8 : f32 to vector<8x1xf32>
    %24 = arith.subf %23, %22 : vector<8x1xf32>
    %25 = math.exp %24 : vector<8x1xf32>
    %cst_9 = arith.constant 1.000000e+00 : f32
    %26 = vector.broadcast %cst_9 : f32 to vector<8x1xf32>
    %27 = arith.addf %26, %25 : vector<8x1xf32>
    %28 = math.log %27 : vector<8x1xf32>
    %29 = arith.subf %21, %28 : vector<8x1xf32>
    %cst_10 = arith.constant 0.000000e+00 : f32
    %30 = vector.broadcast %cst_10 : f32 to vector<8x1xf32>
    %31 = arith.cmpf one, %14, %30 : vector<8x1xf32>
    %cst_11 = arith.constant 0.000000e+00 : f32
    %32 = vector.broadcast %cst_11 : f32 to vector<8x1xf32>
    %33 = arith.select %31, %29, %32 : vector<8x1xi1>, vector<8x1xf32>
    %34 = vector.shape_cast %33 : vector<8x1xf32> to vector<1x8x1xf32>
    %cst_12 = arith.constant dense<0.000000e+00> : vector<1xf32>
    %35 = vector.multi_reduction <add>, %34, %cst_12 [1, 2] : vector<1x8x1xf32> to vector<1xf32>
    %36 = vector.shape_cast %35 : vector<1xf32> to vector<1x1x1xf32>
    %37 = vector.extract %36[0, 0, 0] : f32 from vector<1x1x1xf32>
    %38 = vector.broadcast %37 : f32 to vector<1x1xf32>
    %39 = math.exp %38 : vector<1x1xf32>
    %40 = vector.shape_cast %39 : vector<1x1xf32> to vector<1x1xf32>
    %41 = vector.broadcast %40 : vector<1x1xf32> to vector<1x128xf32>
    %c1_i32 = arith.constant 1 : i32
    %42 = arith.addi %0, %c1_i32 : i32
    %43 = arith.index_cast %42 : i32 to index
    %44 = memref.load %arg1[%43] : memref<8xi32, #tpu.memory_space<smem>>
    %c1_i32_13 = arith.constant 1 : i32
    %45 = arith.addi %0, %c1_i32_13 : i32
    %46 = arith.index_cast %45 : i32 to index
    %47 = memref.load %arg2[%46] : memref<8xi32, #tpu.memory_space<smem>>
    %48 = arith.index_cast %44 : i32 to index
    %c0_14 = arith.constant 0 : index
    %c0_15 = arith.constant 0 : index
    %49 = vector.load %arg4[%48, %c0_14, %c0_15] : memref<16x1x128xf32, #tpu.memory_space<vmem>>, vector<1x1x128xf32>
    %50 = vector.shape_cast %49 : vector<1x1x128xf32> to vector<1x128xf32>
    %51 = arith.index_cast %47 : i32 to index
    %c0_16 = arith.constant 0 : index
    %c0_17 = arith.constant 0 : index
    %52 = vector.load %arg5[%51, %c0_16, %c0_17] : memref<32x8x128xf32, #tpu.memory_space<vmem>>, vector<1x8x128xf32>
    %53 = vector.shape_cast %52 : vector<1x8x128xf32> to vector<8x128xf32>
    %c1 = arith.constant 1 : index
    %c0_18 = arith.constant 0 : index
    %c0_19 = arith.constant 0 : index
    %54 = vector.load %arg3[%c1, %c0_18, %c0_19] : memref<8x8x1xf32, #tpu.memory_space<vmem>>, vector<1x8x1xf32>
    %55 = vector.shape_cast %54 : vector<1x8x1xf32> to vector<8x1xf32>
    %56 = vector.broadcast %50 : vector<1x128xf32> to vector<8x128xf32>
    %57 = arith.mulf %53, %56 : vector<8x128xf32>
    %cst_20 = arith.constant dense<0.000000e+00> : vector<8xf32>
    %58 = vector.multi_reduction <add>, %57, %cst_20 [1] : vector<8x128xf32> to vector<8xf32>
    %59 = vector.shape_cast %58 : vector<8xf32> to vector<8x1xf32>
    %60 = arith.mulf %55, %59 : vector<8x1xf32>
    %cst_21 = arith.constant 0.000000e+00 : f32
    %61 = vector.broadcast %cst_21 : f32 to vector<8x1xf32>
    %62 = arith.minimumf %60, %61 : vector<8x1xf32>
    %63 = math.absf %60 : vector<8x1xf32>
    %cst_22 = arith.constant 0.000000e+00 : f32
    %64 = vector.broadcast %cst_22 : f32 to vector<8x1xf32>
    %65 = arith.subf %64, %63 : vector<8x1xf32>
    %66 = math.exp %65 : vector<8x1xf32>
    %cst_23 = arith.constant 1.000000e+00 : f32
    %67 = vector.broadcast %cst_23 : f32 to vector<8x1xf32>
    %68 = arith.addf %67, %66 : vector<8x1xf32>
    %69 = math.log %68 : vector<8x1xf32>
    %70 = arith.subf %62, %69 : vector<8x1xf32>
    %cst_24 = arith.constant 0.000000e+00 : f32
    %71 = vector.broadcast %cst_24 : f32 to vector<8x1xf32>
    %72 = arith.cmpf one, %55, %71 : vector<8x1xf32>
    %cst_25 = arith.constant 0.000000e+00 : f32
    %73 = vector.broadcast %cst_25 : f32 to vector<8x1xf32>
    %74 = arith.select %72, %70, %73 : vector<8x1xi1>, vector<8x1xf32>
    %75 = vector.shape_cast %74 : vector<8x1xf32> to vector<1x8x1xf32>
    %cst_26 = arith.constant dense<0.000000e+00> : vector<1xf32>
    %76 = vector.multi_reduction <add>, %75, %cst_26 [1, 2] : vector<1x8x1xf32> to vector<1xf32>
    %77 = vector.shape_cast %76 : vector<1xf32> to vector<1x1x1xf32>
    %78 = vector.extract %77[0, 0, 0] : f32 from vector<1x1x1xf32>
    %79 = vector.broadcast %78 : f32 to vector<1x1xf32>
    %80 = math.exp %79 : vector<1x1xf32>
    %81 = vector.shape_cast %80 : vector<1x1xf32> to vector<1x1xf32>
    %82 = vector.broadcast %81 : vector<1x1xf32> to vector<1x128xf32>
    %c2_i32 = arith.constant 2 : i32
    %83 = arith.addi %0, %c2_i32 : i32
    %84 = arith.index_cast %83 : i32 to index
    %85 = memref.load %arg1[%84] : memref<8xi32, #tpu.memory_space<smem>>
    %c2_i32_27 = arith.constant 2 : i32
    %86 = arith.addi %0, %c2_i32_27 : i32
    %87 = arith.index_cast %86 : i32 to index
    %88 = memref.load %arg2[%87] : memref<8xi32, #tpu.memory_space<smem>>
    %89 = arith.index_cast %85 : i32 to index
    %c0_28 = arith.constant 0 : index
    %c0_29 = arith.constant 0 : index
    %90 = vector.load %arg4[%89, %c0_28, %c0_29] : memref<16x1x128xf32, #tpu.memory_space<vmem>>, vector<1x1x128xf32>
    %91 = vector.shape_cast %90 : vector<1x1x128xf32> to vector<1x128xf32>
    %92 = arith.index_cast %88 : i32 to index
    %c0_30 = arith.constant 0 : index
    %c0_31 = arith.constant 0 : index
    %93 = vector.load %arg5[%92, %c0_30, %c0_31] : memref<32x8x128xf32, #tpu.memory_space<vmem>>, vector<1x8x128xf32>
    %94 = vector.shape_cast %93 : vector<1x8x128xf32> to vector<8x128xf32>
    %c2 = arith.constant 2 : index
    %c0_32 = arith.constant 0 : index
    %c0_33 = arith.constant 0 : index
    %95 = vector.load %arg3[%c2, %c0_32, %c0_33] : memref<8x8x1xf32, #tpu.memory_space<vmem>>, vector<1x8x1xf32>
    %96 = vector.shape_cast %95 : vector<1x8x1xf32> to vector<8x1xf32>
    %97 = vector.broadcast %91 : vector<1x128xf32> to vector<8x128xf32>
    %98 = arith.mulf %94, %97 : vector<8x128xf32>
    %cst_34 = arith.constant dense<0.000000e+00> : vector<8xf32>
    %99 = vector.multi_reduction <add>, %98, %cst_34 [1] : vector<8x128xf32> to vector<8xf32>
    %100 = vector.shape_cast %99 : vector<8xf32> to vector<8x1xf32>
    %101 = arith.mulf %96, %100 : vector<8x1xf32>
    %cst_35 = arith.constant 0.000000e+00 : f32
    %102 = vector.broadcast %cst_35 : f32 to vector<8x1xf32>
    %103 = arith.minimumf %101, %102 : vector<8x1xf32>
    %104 = math.absf %101 : vector<8x1xf32>
    %cst_36 = arith.constant 0.000000e+00 : f32
    %105 = vector.broadcast %cst_36 : f32 to vector<8x1xf32>
    %106 = arith.subf %105, %104 : vector<8x1xf32>
    %107 = math.exp %106 : vector<8x1xf32>
    %cst_37 = arith.constant 1.000000e+00 : f32
    %108 = vector.broadcast %cst_37 : f32 to vector<8x1xf32>
    %109 = arith.addf %108, %107 : vector<8x1xf32>
    %110 = math.log %109 : vector<8x1xf32>
    %111 = arith.subf %103, %110 : vector<8x1xf32>
    %cst_38 = arith.constant 0.000000e+00 : f32
    %112 = vector.broadcast %cst_38 : f32 to vector<8x1xf32>
    %113 = arith.cmpf one, %96, %112 : vector<8x1xf32>
    %cst_39 = arith.constant 0.000000e+00 : f32
    %114 = vector.broadcast %cst_39 : f32 to vector<8x1xf32>
    %115 = arith.select %113, %111, %114 : vector<8x1xi1>, vector<8x1xf32>
    %116 = vector.shape_cast %115 : vector<8x1xf32> to vector<1x8x1xf32>
    %cst_40 = arith.constant dense<0.000000e+00> : vector<1xf32>
    %117 = vector.multi_reduction <add>, %116, %cst_40 [1, 2] : vector<1x8x1xf32> to vector<1xf32>
    %118 = vector.shape_cast %117 : vector<1xf32> to vector<1x1x1xf32>
    %119 = vector.extract %118[0, 0, 0] : f32 from vector<1x1x1xf32>
    %120 = vector.broadcast %119 : f32 to vector<1x1xf32>
    %121 = math.exp %120 : vector<1x1xf32>
    %122 = vector.shape_cast %121 : vector<1x1xf32> to vector<1x1xf32>
    %123 = vector.broadcast %122 : vector<1x1xf32> to vector<1x128xf32>
    %c3_i32 = arith.constant 3 : i32
    %124 = arith.addi %0, %c3_i32 : i32
    %125 = arith.index_cast %124 : i32 to index
    %126 = memref.load %arg1[%125] : memref<8xi32, #tpu.memory_space<smem>>
    %c3_i32_41 = arith.constant 3 : i32
    %127 = arith.addi %0, %c3_i32_41 : i32
    %128 = arith.index_cast %127 : i32 to index
    %129 = memref.load %arg2[%128] : memref<8xi32, #tpu.memory_space<smem>>
    %130 = arith.index_cast %126 : i32 to index
    %c0_42 = arith.constant 0 : index
    %c0_43 = arith.constant 0 : index
    %131 = vector.load %arg4[%130, %c0_42, %c0_43] : memref<16x1x128xf32, #tpu.memory_space<vmem>>, vector<1x1x128xf32>
    %132 = vector.shape_cast %131 : vector<1x1x128xf32> to vector<1x128xf32>
    %133 = arith.index_cast %129 : i32 to index
    %c0_44 = arith.constant 0 : index
    %c0_45 = arith.constant 0 : index
    %134 = vector.load %arg5[%133, %c0_44, %c0_45] : memref<32x8x128xf32, #tpu.memory_space<vmem>>, vector<1x8x128xf32>
    %135 = vector.shape_cast %134 : vector<1x8x128xf32> to vector<8x128xf32>
    %c3 = arith.constant 3 : index
    %c0_46 = arith.constant 0 : index
    %c0_47 = arith.constant 0 : index
    %136 = vector.load %arg3[%c3, %c0_46, %c0_47] : memref<8x8x1xf32, #tpu.memory_space<vmem>>, vector<1x8x1xf32>
    %137 = vector.shape_cast %136 : vector<1x8x1xf32> to vector<8x1xf32>
    %138 = vector.broadcast %132 : vector<1x128xf32> to vector<8x128xf32>
    %139 = arith.mulf %135, %138 : vector<8x128xf32>
    %cst_48 = arith.constant dense<0.000000e+00> : vector<8xf32>
    %140 = vector.multi_reduction <add>, %139, %cst_48 [1] : vector<8x128xf32> to vector<8xf32>
    %141 = vector.shape_cast %140 : vector<8xf32> to vector<8x1xf32>
    %142 = arith.mulf %137, %141 : vector<8x1xf32>
    %cst_49 = arith.constant 0.000000e+00 : f32
    %143 = vector.broadcast %cst_49 : f32 to vector<8x1xf32>
    %144 = arith.minimumf %142, %143 : vector<8x1xf32>
    %145 = math.absf %142 : vector<8x1xf32>
    %cst_50 = arith.constant 0.000000e+00 : f32
    %146 = vector.broadcast %cst_50 : f32 to vector<8x1xf32>
    %147 = arith.subf %146, %145 : vector<8x1xf32>
    %148 = math.exp %147 : vector<8x1xf32>
    %cst_51 = arith.constant 1.000000e+00 : f32
    %149 = vector.broadcast %cst_51 : f32 to vector<8x1xf32>
    %150 = arith.addf %149, %148 : vector<8x1xf32>
    %151 = math.log %150 : vector<8x1xf32>
    %152 = arith.subf %144, %151 : vector<8x1xf32>
    %cst_52 = arith.constant 0.000000e+00 : f32
    %153 = vector.broadcast %cst_52 : f32 to vector<8x1xf32>
    %154 = arith.cmpf one, %137, %153 : vector<8x1xf32>
    %cst_53 = arith.constant 0.000000e+00 : f32
    %155 = vector.broadcast %cst_53 : f32 to vector<8x1xf32>
    %156 = arith.select %154, %152, %155 : vector<8x1xi1>, vector<8x1xf32>
    %157 = vector.shape_cast %156 : vector<8x1xf32> to vector<1x8x1xf32>
    %cst_54 = arith.constant dense<0.000000e+00> : vector<1xf32>
    %158 = vector.multi_reduction <add>, %157, %cst_54 [1, 2] : vector<1x8x1xf32> to vector<1xf32>
    %159 = vector.shape_cast %158 : vector<1xf32> to vector<1x1x1xf32>
    %160 = vector.extract %159[0, 0, 0] : f32 from vector<1x1x1xf32>
    %161 = vector.broadcast %160 : f32 to vector<1x1xf32>
    %162 = math.exp %161 : vector<1x1xf32>
    %163 = vector.shape_cast %162 : vector<1x1xf32> to vector<1x1xf32>
    %164 = vector.broadcast %163 : vector<1x1xf32> to vector<1x128xf32>
    %c4_i32 = arith.constant 4 : i32
    %165 = arith.addi %0, %c4_i32 : i32
    %166 = arith.index_cast %165 : i32 to index
    %167 = memref.load %arg1[%166] : memref<8xi32, #tpu.memory_space<smem>>
    %c4_i32_55 = arith.constant 4 : i32
    %168 = arith.addi %0, %c4_i32_55 : i32
    %169 = arith.index_cast %168 : i32 to index
    %170 = memref.load %arg2[%169] : memref<8xi32, #tpu.memory_space<smem>>
    %171 = arith.index_cast %167 : i32 to index
    %c0_56 = arith.constant 0 : index
    %c0_57 = arith.constant 0 : index
    %172 = vector.load %arg4[%171, %c0_56, %c0_57] : memref<16x1x128xf32, #tpu.memory_space<vmem>>, vector<1x1x128xf32>
    %173 = vector.shape_cast %172 : vector<1x1x128xf32> to vector<1x128xf32>
    %174 = arith.index_cast %170 : i32 to index
    %c0_58 = arith.constant 0 : index
    %c0_59 = arith.constant 0 : index
    %175 = vector.load %arg5[%174, %c0_58, %c0_59] : memref<32x8x128xf32, #tpu.memory_space<vmem>>, vector<1x8x128xf32>
    %176 = vector.shape_cast %175 : vector<1x8x128xf32> to vector<8x128xf32>
    %c4 = arith.constant 4 : index
    %c0_60 = arith.constant 0 : index
    %c0_61 = arith.constant 0 : index
    %177 = vector.load %arg3[%c4, %c0_60, %c0_61] : memref<8x8x1xf32, #tpu.memory_space<vmem>>, vector<1x8x1xf32>
    %178 = vector.shape_cast %177 : vector<1x8x1xf32> to vector<8x1xf32>
    %179 = vector.broadcast %173 : vector<1x128xf32> to vector<8x128xf32>
    %180 = arith.mulf %176, %179 : vector<8x128xf32>
    %cst_62 = arith.constant dense<0.000000e+00> : vector<8xf32>
    %181 = vector.multi_reduction <add>, %180, %cst_62 [1] : vector<8x128xf32> to vector<8xf32>
    %182 = vector.shape_cast %181 : vector<8xf32> to vector<8x1xf32>
    %183 = arith.mulf %178, %182 : vector<8x1xf32>
    %cst_63 = arith.constant 0.000000e+00 : f32
    %184 = vector.broadcast %cst_63 : f32 to vector<8x1xf32>
    %185 = arith.minimumf %183, %184 : vector<8x1xf32>
    %186 = math.absf %183 : vector<8x1xf32>
    %cst_64 = arith.constant 0.000000e+00 : f32
    %187 = vector.broadcast %cst_64 : f32 to vector<8x1xf32>
    %188 = arith.subf %187, %186 : vector<8x1xf32>
    %189 = math.exp %188 : vector<8x1xf32>
    %cst_65 = arith.constant 1.000000e+00 : f32
    %190 = vector.broadcast %cst_65 : f32 to vector<8x1xf32>
    %191 = arith.addf %190, %189 : vector<8x1xf32>
    %192 = math.log %191 : vector<8x1xf32>
    %193 = arith.subf %185, %192 : vector<8x1xf32>
    %cst_66 = arith.constant 0.000000e+00 : f32
    %194 = vector.broadcast %cst_66 : f32 to vector<8x1xf32>
    %195 = arith.cmpf one, %178, %194 : vector<8x1xf32>
    %cst_67 = arith.constant 0.000000e+00 : f32
    %196 = vector.broadcast %cst_67 : f32 to vector<8x1xf32>
    %197 = arith.select %195, %193, %196 : vector<8x1xi1>, vector<8x1xf32>
    %198 = vector.shape_cast %197 : vector<8x1xf32> to vector<1x8x1xf32>
    %cst_68 = arith.constant dense<0.000000e+00> : vector<1xf32>
    %199 = vector.multi_reduction <add>, %198, %cst_68 [1, 2] : vector<1x8x1xf32> to vector<1xf32>
    %200 = vector.shape_cast %199 : vector<1xf32> to vector<1x1x1xf32>
    %201 = vector.extract %200[0, 0, 0] : f32 from vector<1x1x1xf32>
    %202 = vector.broadcast %201 : f32 to vector<1x1xf32>
    %203 = math.exp %202 : vector<1x1xf32>
    %204 = vector.shape_cast %203 : vector<1x1xf32> to vector<1x1xf32>
    %205 = vector.broadcast %204 : vector<1x1xf32> to vector<1x128xf32>
    %c5_i32 = arith.constant 5 : i32
    %206 = arith.addi %0, %c5_i32 : i32
    %207 = arith.index_cast %206 : i32 to index
    %208 = memref.load %arg1[%207] : memref<8xi32, #tpu.memory_space<smem>>
    %c5_i32_69 = arith.constant 5 : i32
    %209 = arith.addi %0, %c5_i32_69 : i32
    %210 = arith.index_cast %209 : i32 to index
    %211 = memref.load %arg2[%210] : memref<8xi32, #tpu.memory_space<smem>>
    %212 = arith.index_cast %208 : i32 to index
    %c0_70 = arith.constant 0 : index
    %c0_71 = arith.constant 0 : index
    %213 = vector.load %arg4[%212, %c0_70, %c0_71] : memref<16x1x128xf32, #tpu.memory_space<vmem>>, vector<1x1x128xf32>
    %214 = vector.shape_cast %213 : vector<1x1x128xf32> to vector<1x128xf32>
    %215 = arith.index_cast %211 : i32 to index
    %c0_72 = arith.constant 0 : index
    %c0_73 = arith.constant 0 : index
    %216 = vector.load %arg5[%215, %c0_72, %c0_73] : memref<32x8x128xf32, #tpu.memory_space<vmem>>, vector<1x8x128xf32>
    %217 = vector.shape_cast %216 : vector<1x8x128xf32> to vector<8x128xf32>
    %c5 = arith.constant 5 : index
    %c0_74 = arith.constant 0 : index
    %c0_75 = arith.constant 0 : index
    %218 = vector.load %arg3[%c5, %c0_74, %c0_75] : memref<8x8x1xf32, #tpu.memory_space<vmem>>, vector<1x8x1xf32>
    %219 = vector.shape_cast %218 : vector<1x8x1xf32> to vector<8x1xf32>
    %220 = vector.broadcast %214 : vector<1x128xf32> to vector<8x128xf32>
    %221 = arith.mulf %217, %220 : vector<8x128xf32>
    %cst_76 = arith.constant dense<0.000000e+00> : vector<8xf32>
    %222 = vector.multi_reduction <add>, %221, %cst_76 [1] : vector<8x128xf32> to vector<8xf32>
    %223 = vector.shape_cast %222 : vector<8xf32> to vector<8x1xf32>
    %224 = arith.mulf %219, %223 : vector<8x1xf32>
    %cst_77 = arith.constant 0.000000e+00 : f32
    %225 = vector.broadcast %cst_77 : f32 to vector<8x1xf32>
    %226 = arith.minimumf %224, %225 : vector<8x1xf32>
    %227 = math.absf %224 : vector<8x1xf32>
    %cst_78 = arith.constant 0.000000e+00 : f32
    %228 = vector.broadcast %cst_78 : f32 to vector<8x1xf32>
    %229 = arith.subf %228, %227 : vector<8x1xf32>
    %230 = math.exp %229 : vector<8x1xf32>
    %cst_79 = arith.constant 1.000000e+00 : f32
    %231 = vector.broadcast %cst_79 : f32 to vector<8x1xf32>
    %232 = arith.addf %231, %230 : vector<8x1xf32>
    %233 = math.log %232 : vector<8x1xf32>
    %234 = arith.subf %226, %233 : vector<8x1xf32>
    %cst_80 = arith.constant 0.000000e+00 : f32
    %235 = vector.broadcast %cst_80 : f32 to vector<8x1xf32>
    %236 = arith.cmpf one, %219, %235 : vector<8x1xf32>
    %cst_81 = arith.constant 0.000000e+00 : f32
    %237 = vector.broadcast %cst_81 : f32 to vector<8x1xf32>
    %238 = arith.select %236, %234, %237 : vector<8x1xi1>, vector<8x1xf32>
    %239 = vector.shape_cast %238 : vector<8x1xf32> to vector<1x8x1xf32>
    %cst_82 = arith.constant dense<0.000000e+00> : vector<1xf32>
    %240 = vector.multi_reduction <add>, %239, %cst_82 [1, 2] : vector<1x8x1xf32> to vector<1xf32>
    %241 = vector.shape_cast %240 : vector<1xf32> to vector<1x1x1xf32>
    %242 = vector.extract %241[0, 0, 0] : f32 from vector<1x1x1xf32>
    %243 = vector.broadcast %242 : f32 to vector<1x1xf32>
    %244 = math.exp %243 : vector<1x1xf32>
    %245 = vector.shape_cast %244 : vector<1x1xf32> to vector<1x1xf32>
    %246 = vector.broadcast %245 : vector<1x1xf32> to vector<1x128xf32>
    %c6_i32 = arith.constant 6 : i32
    %247 = arith.addi %0, %c6_i32 : i32
    %248 = arith.index_cast %247 : i32 to index
    %249 = memref.load %arg1[%248] : memref<8xi32, #tpu.memory_space<smem>>
    %c6_i32_83 = arith.constant 6 : i32
    %250 = arith.addi %0, %c6_i32_83 : i32
    %251 = arith.index_cast %250 : i32 to index
    %252 = memref.load %arg2[%251] : memref<8xi32, #tpu.memory_space<smem>>
    %253 = arith.index_cast %249 : i32 to index
    %c0_84 = arith.constant 0 : index
    %c0_85 = arith.constant 0 : index
    %254 = vector.load %arg4[%253, %c0_84, %c0_85] : memref<16x1x128xf32, #tpu.memory_space<vmem>>, vector<1x1x128xf32>
    %255 = vector.shape_cast %254 : vector<1x1x128xf32> to vector<1x128xf32>
    %256 = arith.index_cast %252 : i32 to index
    %c0_86 = arith.constant 0 : index
    %c0_87 = arith.constant 0 : index
    %257 = vector.load %arg5[%256, %c0_86, %c0_87] : memref<32x8x128xf32, #tpu.memory_space<vmem>>, vector<1x8x128xf32>
    %258 = vector.shape_cast %257 : vector<1x8x128xf32> to vector<8x128xf32>
    %c6 = arith.constant 6 : index
    %c0_88 = arith.constant 0 : index
    %c0_89 = arith.constant 0 : index
    %259 = vector.load %arg3[%c6, %c0_88, %c0_89] : memref<8x8x1xf32, #tpu.memory_space<vmem>>, vector<1x8x1xf32>
    %260 = vector.shape_cast %259 : vector<1x8x1xf32> to vector<8x1xf32>
    %261 = vector.broadcast %255 : vector<1x128xf32> to vector<8x128xf32>
    %262 = arith.mulf %258, %261 : vector<8x128xf32>
    %cst_90 = arith.constant dense<0.000000e+00> : vector<8xf32>
    %263 = vector.multi_reduction <add>, %262, %cst_90 [1] : vector<8x128xf32> to vector<8xf32>
    %264 = vector.shape_cast %263 : vector<8xf32> to vector<8x1xf32>
    %265 = arith.mulf %260, %264 : vector<8x1xf32>
    %cst_91 = arith.constant 0.000000e+00 : f32
    %266 = vector.broadcast %cst_91 : f32 to vector<8x1xf32>
    %267 = arith.minimumf %265, %266 : vector<8x1xf32>
    %268 = math.absf %265 : vector<8x1xf32>
    %cst_92 = arith.constant 0.000000e+00 : f32
    %269 = vector.broadcast %cst_92 : f32 to vector<8x1xf32>
    %270 = arith.subf %269, %268 : vector<8x1xf32>
    %271 = math.exp %270 : vector<8x1xf32>
    %cst_93 = arith.constant 1.000000e+00 : f32
    %272 = vector.broadcast %cst_93 : f32 to vector<8x1xf32>
    %273 = arith.addf %272, %271 : vector<8x1xf32>
    %274 = math.log %273 : vector<8x1xf32>
    %275 = arith.subf %267, %274 : vector<8x1xf32>
    %cst_94 = arith.constant 0.000000e+00 : f32
    %276 = vector.broadcast %cst_94 : f32 to vector<8x1xf32>
    %277 = arith.cmpf one, %260, %276 : vector<8x1xf32>
    %cst_95 = arith.constant 0.000000e+00 : f32
    %278 = vector.broadcast %cst_95 : f32 to vector<8x1xf32>
    %279 = arith.select %277, %275, %278 : vector<8x1xi1>, vector<8x1xf32>
    %280 = vector.shape_cast %279 : vector<8x1xf32> to vector<1x8x1xf32>
    %cst_96 = arith.constant dense<0.000000e+00> : vector<1xf32>
    %281 = vector.multi_reduction <add>, %280, %cst_96 [1, 2] : vector<1x8x1xf32> to vector<1xf32>
    %282 = vector.shape_cast %281 : vector<1xf32> to vector<1x1x1xf32>
    %283 = vector.extract %282[0, 0, 0] : f32 from vector<1x1x1xf32>
    %284 = vector.broadcast %283 : f32 to vector<1x1xf32>
    %285 = math.exp %284 : vector<1x1xf32>
    %286 = vector.shape_cast %285 : vector<1x1xf32> to vector<1x1xf32>
    %287 = vector.broadcast %286 : vector<1x1xf32> to vector<1x128xf32>
    %c7_i32 = arith.constant 7 : i32
    %288 = arith.addi %0, %c7_i32 : i32
    %289 = arith.index_cast %288 : i32 to index
    %290 = memref.load %arg1[%289] : memref<8xi32, #tpu.memory_space<smem>>
    %c7_i32_97 = arith.constant 7 : i32
    %291 = arith.addi %0, %c7_i32_97 : i32
    %292 = arith.index_cast %291 : i32 to index
    %293 = memref.load %arg2[%292] : memref<8xi32, #tpu.memory_space<smem>>
    %294 = arith.index_cast %290 : i32 to index
    %c0_98 = arith.constant 0 : index
    %c0_99 = arith.constant 0 : index
    %295 = vector.load %arg4[%294, %c0_98, %c0_99] : memref<16x1x128xf32, #tpu.memory_space<vmem>>, vector<1x1x128xf32>
    %296 = vector.shape_cast %295 : vector<1x1x128xf32> to vector<1x128xf32>
    %297 = arith.index_cast %293 : i32 to index
    %c0_100 = arith.constant 0 : index
    %c0_101 = arith.constant 0 : index
    %298 = vector.load %arg5[%297, %c0_100, %c0_101] : memref<32x8x128xf32, #tpu.memory_space<vmem>>, vector<1x8x128xf32>
    %299 = vector.shape_cast %298 : vector<1x8x128xf32> to vector<8x128xf32>
    %c7 = arith.constant 7 : index
    %c0_102 = arith.constant 0 : index
    %c0_103 = arith.constant 0 : index
    %300 = vector.load %arg3[%c7, %c0_102, %c0_103] : memref<8x8x1xf32, #tpu.memory_space<vmem>>, vector<1x8x1xf32>
    %301 = vector.shape_cast %300 : vector<1x8x1xf32> to vector<8x1xf32>
    %302 = vector.broadcast %296 : vector<1x128xf32> to vector<8x128xf32>
    %303 = arith.mulf %299, %302 : vector<8x128xf32>
    %cst_104 = arith.constant dense<0.000000e+00> : vector<8xf32>
    %304 = vector.multi_reduction <add>, %303, %cst_104 [1] : vector<8x128xf32> to vector<8xf32>
    %305 = vector.shape_cast %304 : vector<8xf32> to vector<8x1xf32>
    %306 = arith.mulf %301, %305 : vector<8x1xf32>
    %cst_105 = arith.constant 0.000000e+00 : f32
    %307 = vector.broadcast %cst_105 : f32 to vector<8x1xf32>
    %308 = arith.minimumf %306, %307 : vector<8x1xf32>
    %309 = math.absf %306 : vector<8x1xf32>
    %cst_106 = arith.constant 0.000000e+00 : f32
    %310 = vector.broadcast %cst_106 : f32 to vector<8x1xf32>
    %311 = arith.subf %310, %309 : vector<8x1xf32>
    %312 = math.exp %311 : vector<8x1xf32>
    %cst_107 = arith.constant 1.000000e+00 : f32
    %313 = vector.broadcast %cst_107 : f32 to vector<8x1xf32>
    %314 = arith.addf %313, %312 : vector<8x1xf32>
    %315 = math.log %314 : vector<8x1xf32>
    %316 = arith.subf %308, %315 : vector<8x1xf32>
    %cst_108 = arith.constant 0.000000e+00 : f32
    %317 = vector.broadcast %cst_108 : f32 to vector<8x1xf32>
    %318 = arith.cmpf one, %301, %317 : vector<8x1xf32>
    %cst_109 = arith.constant 0.000000e+00 : f32
    %319 = vector.broadcast %cst_109 : f32 to vector<8x1xf32>
    %320 = arith.select %318, %316, %319 : vector<8x1xi1>, vector<8x1xf32>
    %321 = vector.shape_cast %320 : vector<8x1xf32> to vector<1x8x1xf32>
    %cst_110 = arith.constant dense<0.000000e+00> : vector<1xf32>
    %322 = vector.multi_reduction <add>, %321, %cst_110 [1, 2] : vector<1x8x1xf32> to vector<1xf32>
    %323 = vector.shape_cast %322 : vector<1xf32> to vector<1x1x1xf32>
    %324 = vector.extract %323[0, 0, 0] : f32 from vector<1x1x1xf32>
    %325 = vector.broadcast %324 : f32 to vector<1x1xf32>
    %326 = math.exp %325 : vector<1x1xf32>
    %327 = vector.shape_cast %326 : vector<1x1xf32> to vector<1x1xf32>
    %328 = vector.broadcast %327 : vector<1x1xf32> to vector<1x128xf32>
    %329 = tpu.concatenate %41, %82, %123, %164, %205, %246, %287, %328 in 0 : vector<1x128xf32>, vector<1x128xf32>, vector<1x128xf32>, vector<1x128xf32>, vector<1x128xf32>, vector<1x128xf32>, vector<1x128xf32>, vector<1x128xf32> -> vector<8x128xf32>
    %c0_111 = arith.constant 0 : index
    %c0_112 = arith.constant 0 : index
    %330 = vector.load %arg6[%c0_111, %c0_112] : memref<8x128xf32, #tpu.memory_space<vmem>>, vector<8x128xf32>
    tpu.vector_store %arg6[%c0_111, %c0_112], %329 {strides = array<i32>} : memref<8x128xf32, #tpu.memory_space<vmem>>, vector<8x128xf32>,
    return
  }
  func.func @transform_0(%arg0: i32) -> i32 {
    %c0_i32 = arith.constant 0 : i32
    %c0_i32_0 = arith.constant 0 : i32
    return %c0_i32 : i32
  }
  func.func @transform_1(%arg0: i32) -> i32 {
    %c0_i32 = arith.constant 0 : i32
    %c0_i32_0 = arith.constant 0 : i32
    return %c0_i32 : i32
  }
  func.func @transform_2(%arg0: i32) -> (i32, i32, i32) {
    %c0_i32 = arith.constant 0 : i32
    %c0_i32_0 = arith.constant 0 : i32
    %c0_i32_1 = arith.constant 0 : i32
    return %arg0, %c0_i32, %c0_i32_0 : i32, i32, i32
  }
  func.func @transform_3(%arg0: i32) -> (i32, i32, i32) {
    %c0_i32 = arith.constant 0 : i32
    %c0_i32_0 = arith.constant 0 : i32
    %c0_i32_1 = arith.constant 0 : i32
    %c0_i32_2 = arith.constant 0 : i32
    return %c0_i32, %c0_i32_0, %c0_i32_1 : i32, i32, i32
  }
  func.func @transform_4(%arg0: i32) -> (i32, i32, i32) {
    %c0_i32 = arith.constant 0 : i32
    %c0_i32_0 = arith.constant 0 : i32
    %c0_i32_1 = arith.constant 0 : i32
    %c0_i32_2 = arith.constant 0 : i32
    return %c0_i32, %c0_i32_0, %c0_i32_1 : i32, i32, i32
  }
  func.func @transform_5(%arg0: i32) -> (i32, i32) {
    %c0_i32 = arith.constant 0 : i32
    %c0_i32_0 = arith.constant 0 : i32
    return %arg0, %c0_i32 : i32, i32
  }
}

</mosaic_0001>

<bundles_post_ra>
// kernel: tpu_custom_call.1
= control target key start
LH: loop header
LB: loop body
LE: loop exit
PB: predicated region body
PF: predicated region fallthrough
CT: control target
= control target key end

     0   :  { %10 = vsyncpa [#allocation5], 0  ;;  %s805_s0 = inlined_call_operand.vmem [shape: s32[8], index: 0, kind: input, shape index: {}]   ;;  %s806_s1 = inlined_call_operand.vmem [shape: s32[8], index: 1, kind: input, shape index: {}]   ;;  %s807_s2 = inlined_call_operand.vmem [shape: f32[8,8,1], index: 2, kind: input, shape index: {}]   ;;  %s808_s3 = inlined_call_operand.vmem [shape: f32[16,1,128], index: 3, kind: input, shape index: {}]   ;;  %s809_s4 = inlined_call_operand.hbm [shape: f32[32,8,128], index: 4, kind: input, shape index: {}]   ;;  %s810_s5 = inlined_call_operand.hbm [shape: f32[8,128], index: 5, kind: output, shape index: {}]  }
   0x1   :  { %11 = vsyncpa [#allocation7], 0 }
   0x2   :  { %12 = vsyncpa [#allocation3], 0 }
   0x3   :  { %13 = vsyncpa [#allocation4], 0  ;;  %s19_s20 = sshll.u32 %s805_s0, 4  ;;  %s28_s23 = sshll.u32 %s806_s1, 4  ;;  %s20_s20 = int_to_ptr.vmem [resolvable:$true] %s19_s20  ;;  %s29_s23 = int_to_ptr.vmem [resolvable:$true] %s28_s23 }
   0x4   :  { %s635_s24 = smov [#allocation2]   ;;  %s636_s25 = smov [#allocation6]  }
   0x5   :  { %22 = dma.vmem_to_smem %s20_s20, 16, %s635_s24, [#allocation5]  }
   0x6   :  { %31 = dma.vmem_to_smem %s29_s23, 16, %s636_s25, [#allocation7]  }
   0x7   :  { %s40_s28 = sshll.u32 %s809_s4, 4  ;;  %s637_s29 = smov [#allocation8]   ;;  %s41_s28 = int_to_ptr.hbm [resolvable:$true] %s40_s28 }
   0x8   :  { %s42_s30 = sshll.u32 %s637_s29, 4  ;;  %s638_s6 = smov 128   ;;  %s43_s30 = int_to_ptr.vmem [resolvable:$true] %s42_s30 }
   0x9   :  { %s639_s0 = smov 8  }
   0xa   :  { %48 = dma.hbm_to_vmem [thread:$0]  %s41_s28, 4096, %s43_s30, [#allocation3], %s638_s6, %s638_s6, %s639_s0  }
   0xb   :  { %627 = dma.done.wait [#allocation5], 16  }
   0xc   :  { %628 = vsyncadd [#allocation5], 4294967280 }
   0xd   :  { %629 = dma.done.wait [#allocation7], 16  }
   0xe   :  { %630 = vsyncadd [#allocation7], 4294967280 }
   0xf   :  { %631 = dma.done.wait [#allocation3], 4096  }
  0x10   :  { %632 = vsyncadd [#allocation3], 4294963200 }
  0x11   :  { %61 = sfence }
  0x12   :  { %s461_s1 = sld [smem:[#allocation2 + $0x4]]  ;;  %v707_v24 = vld [vmem:[%s807_s2 + $0x20] sm:$0xff]  ;;  %v712_v26 = vld [vmem:[%s807_s2 + $0x10] sm:$0xff]  ;;  %v734_v39 = vld [vmem:[%s807_s2 + $0x28] sm:$0xff]  ;;  %vm89_vm1 = vcmask 7168   ;;  %vm390_vm9 = vcmask 1040384  }
  0x13   :  { %s462_s7 = sld [smem:[#allocation6 + $0x4]]  ;;  %v717_v28 = vld [vmem:[%s807_s2] sm:$0xff]  ;;  %v739_v43 = vld [vmem:[%s807_s2 + $0x18] sm:$0xff]  ;;  %v751_v48 = vld [vmem:[%s807_s2 + $0x8] sm:$0xff]  ;;  %vm170_vm0 = vcmp.ne.f32.partialorder %v712_v26, 0.0  ;;  %vm293_vm3 = vcmp.ne.f32.partialorder %v734_v39, 0.0 }
  0x14   :  { %s453_s8 = sld [smem:[#allocation2 + $0x2]]  ;;  %v761_v60 = vld [vmem:[%s807_s2 + $0x38] sm:$0xff]  ;;  %vm87_vm2 = vcmp.ne.f32.partialorder %v717_v28, 0.0  ;;  %vm211_vm4 = vcmp.ne.f32.partialorder %v739_v43, 0.0  ;;  %vm129_vm5 = vcmp.ne.f32.partialorder %v751_v48, 0.0  ;;  %vm252_vm6 = vcmp.ne.f32.partialorder %v707_v24, 0.0 }
  0x15   :  { %s454_s9 = sld [smem:[#allocation6 + $0x2]]  ;;  %vm375_vm8 = vcmp.ne.f32.partialorder %v761_v60, 0.0  ;;  %vm392_vm10 = vcmask 1041408   ;;  %vm394_vm11 = vcmask 1042432   ;;  %vm396_vm12 = vcmask 1043456  }
  0x16   :  { %s63_s10 = sld [smem:[#allocation2]]  ;;  %vm398_vm13 = vcmask 1044480   ;;  %vm400_vm14 = vcmask 1045504   ;;  %vm402_vm15 = vcmask 1046528  }
  0x17   :  { %s64_s4 = sld [smem:[#allocation6]] }
  0x18   :  { %s229_s13 = scalar_lea.vmem %s808_s3, %s461_s1  ;;  %s465_s14 = sld [smem:[#allocation2 + $0x5]] }
  0x19   :  { %s463_s15 = sshll.u32 %s462_s7, 3  ;;  %v499_v0 = vld [vmem:[%s229_s13] ss:$0 sm:$0xff]  ;;  %s466_s26 = sld [smem:[#allocation6 + $0x5]] }
  0x1a   :  { %s147_s18 = scalar_lea.vmem %s808_s3, %s453_s8  ;;  %s232_s19 = scalar_lea.vmem [#allocation8], %s463_s15 }
  0x1b   :  { %v233_v1 = vld [vmem:[%s232_s19] sm:$0xff]  ;;  %s455_s20 = sshll.u32 %s454_s9, 3  ;;  %s457_s6 = sld [smem:[#allocation2 + $0x3]] }
  0x1c   :  { %v500_v2 = vld [vmem:[%s147_s18] ss:$0 sm:$0xff]  ;;  %v239_v3 = vmul.f32 %v499_v0, %v233_v1  ;;  %s65_s23 = scalar_lea.vmem %s808_s3, %s63_s10  ;;  %s150_s24 = scalar_lea.vmem [#allocation8], %s455_s20 }
  0x1d   :  { %v151_v4 = vld [vmem:[%s150_s24] sm:$0xff]  ;;  %s448_s25 = sshll.u32 %s64_s4, 3  ;;  %s458_s0 = sld [smem:[#allocation6 + $0x3]] }
  0x1e   :  { %v501_v5 = vld [vmem:[%s65_s23] ss:$0 sm:$0xff]  ;;  %240 = vadd.xlane.f32.xlu2 %v239_v3  ;;  %v157_v6 = vmul.f32 %v500_v2, %v151_v4  ;;  %s68_s27 = scalar_lea.vmem [#allocation8], %s448_s25  ;;  %s270_s30 = scalar_lea.vmem %s808_s3, %s465_s14  ;;  %v769_v3 = vld [vmem:[%s807_s2 + $0x30] sm:$0xff] }
  0x1f   :  { %v69_v7 = vld [vmem:[%s68_s27] sm:$0xff]  ;;  %s449_s1 = sld [smem:[#allocation2 + $0x1]]  ;;  %s467_s9 = sshll.u32 %s466_s26, 3  ;;  %vm334_vm7 = vcmp.ne.f32.partialorder %v769_v3, 0.0 }
  0x20   :  { %158 = vadd.xlane.f32.xlu1 %v157_v6  ;;  %v74_v8 = vmul.f32 %v501_v5, %v69_v7  ;;  %s450_s7 = sld [smem:[#allocation6 + $0x1]]  ;;  %v502_v9 = vld [vmem:[%s270_s30] ss:$0 sm:$0xff]  ;;  %s273_s13 = scalar_lea.vmem [#allocation8], %s467_s9 }
  0x21   :  { %s473_s8 = sld [smem:[#allocation2 + $0x7]]  ;;  %s188_s12 = scalar_lea.vmem %s808_s3, %s457_s6  ;;  %v274_v10 = vld [vmem:[%s273_s13] sm:$0xff] }
  0x22   :  { %75 = vadd.xlane.f32.xlu0 %v74_v8  ;;  %s474_s10 = sld [smem:[#allocation6 + $0x7]]  ;;  %v503_v11 = vld [vmem:[%s188_s12] ss:$0 sm:$0xff]  ;;  %v280_v12 = vmul.f32 %v502_v9, %v274_v10 }
  0x23   :  { %s459_s15 = sshll.u32 %s458_s0, 3  ;;  %s469_s25 = sld [smem:[#allocation2 + $0x6]] }
  0x24   :  { %s191_s18 = scalar_lea.vmem [#allocation8], %s459_s15  ;;  %s470_s27 = sld [smem:[#allocation6 + $0x6]] }
  0x25   :  { %s106_s17 = scalar_lea.vmem %s808_s3, %s449_s1  ;;  %v192_v13 = vld [vmem:[%s191_s18] sm:$0xff] }
  0x26   :  { %s451_s19 = sshll.u32 %s450_s7, 3  ;;  %v504_v14 = vld [vmem:[%s106_s17] ss:$0 sm:$0xff]  ;;  %281 = vadd.xlane.f32.xlu2 %v280_v12  ;;  %v198_v15 = vmul.f32 %v503_v11, %v192_v13 }
  0x27   :  { %s352_s22 = scalar_lea.vmem %s808_s3, %s473_s8  ;;  %s109_s23 = scalar_lea.vmem [#allocation8], %s451_s19 }
  0x28   :  { %v110_v16 = vld [vmem:[%s109_s23] sm:$0xff]  ;;  %s475_s24 = sshll.u32 %s474_s10, 3  ;;  %199 = vadd.xlane.f32.xlu1 %v198_v15 }
  0x29   :  { %v116_v17 = vmul.f32 %v504_v14, %v110_v16  ;;  %v505_v18 = vld [vmem:[%s352_s22] ss:$0 sm:$0xff]  ;;  %s355_s26 = scalar_lea.vmem [#allocation8], %s475_s24  ;;  %s311_s30 = scalar_lea.vmem %s808_s3, %s469_s25 }
  0x2a   :  { %v356_v19 = vld [vmem:[%s355_s26] sm:$0xff]  ;;  %s471_s6 = sshll.u32 %s470_s27, 3  ;;  %s640_s27 = smov [#allocation9]  }
  0x2b   :  { %117 = vadd.xlane.f32.xlu0 %v116_v17  ;;  %v362_v20 = vmul.f32 %v505_v18, %v356_v19  ;;  %v506_v21 = vld [vmem:[%s311_s30] ss:$0 sm:$0xff]  ;;  %s314_s0 = scalar_lea.vmem [#allocation8], %s471_s6  ;;  %s410_s28 = sshll.u32 %s640_s27, 4  ;;  %s411_s28 = int_to_ptr.vmem [resolvable:$true] %s410_s28 }
  0x2c   :  { %v315_v22 = vld [vmem:[%s314_s0] sm:$0xff]  ;;  %s412_s6 = sshll.u32 %s810_s5, 4  ;;  %s413_s6 = int_to_ptr.hbm [resolvable:$true] %s412_s6 }
  0x2d   :  { %v321_v23 = vmul.f32 %v506_v21, %v315_v22 }
  0x30   :  { %363 = vadd.xlane.f32.xlu1 %v362_v20 }
  0x33   :  { %322 = vadd.xlane.f32.xlu0 %v321_v23 }
  0x91   :  { %v241_v25 = vpop.xlane.xlu2 %240 }
  0x92   :  { %v720_v29 = vmul.f32 %v707_v24, %v241_v25 }
  0x93   :  { %v159_v27 = vpop.xlane.xlu1 %158 }
  0x94   :  { %v723_v30 = vmul.f32 %v712_v26, %v159_v27  ;;  %v244_v34 = vand.u32 2147483647, %v720_v29 }
  0x95   :  { %v76_v31 = vpop.xlane.xlu0 %75 }
  0x96   :  { %v162_v32 = vand.u32 2147483647, %v723_v30  ;;  %v727_v33 = vmul.f32 %v76_v31, %v717_v28  ;;  %v245_v40 = vsub.f32 0.0, %v244_v34  ;;  %v161_v11 = vmin.f32 %v723_v30, 0.0 }
  0x98   :  { %v163_v35 = vsub.f32 0.0, %v162_v32  ;;  %v79_v36 = vand.u32 2147483647, %v727_v33  ;;  %v246_v49 = vmul.f32 1.442695, %v245_v40  ;;  %v78_v14 = vmin.f32 %v727_v33, 0.0 }
  0x99   :  { %v282_v42 = vpop.xlane.xlu2 %281 }
  0x9a   :  { %v164_v37 = vmul.f32 1.442695, %v163_v35  ;;  %v80_v38 = vsub.f32 0.0, %v79_v36  ;;  %v742_v44 = vmul.f32 %v734_v39, %v282_v42 }
  0x9b   :  { %v200_v45 = vpop.xlane.xlu1 %199 }
  0x9c   :  { %507 = vpow2.f32 %v164_v37  ;;  %v81_v41 = vmul.f32 1.442695, %v80_v38  ;;  %v285_v46 = vand.u32 2147483647, %v742_v44  ;;  %v746_v47 = vmul.f32 %v739_v43, %v200_v45 }
  0x9d   :  { %v284_v37 = vmin.f32 %v742_v44, 0.0  ;;  %v243_v43 = vmin.f32 %v720_v29, 0.0 }
  0x9e   :  { %509 = vpow2.f32 %v81_v41  ;;  %v118_v50 = vpop.xlane.xlu0 %117  ;;  %v286_v51 = vsub.f32 0.0, %v285_v46  ;;  %v203_v52 = vand.u32 2147483647, %v746_v47  ;;  %v202_v42 = vmin.f32 %v746_v47, 0.0 }
  0x9f   :  { %v755_v54 = vmul.f32 %v751_v48, %v118_v50  ;;  %511 = vpow2.f32 %v246_v49 }
  0xa0   :  { %v287_v56 = vmul.f32 1.442695, %v286_v51  ;;  %v204_v57 = vsub.f32 0.0, %v203_v52 }
  0xa1   :  { %v121_v59 = vand.u32 2147483647, %v755_v54  ;;  %v120_v51 = vmin.f32 %v755_v54, 0.0 }
  0xa2   :  { %v508_v53 = vpop.eup %507  ;;  %v205_v62 = vmul.f32 1.442695, %v204_v57 }
  0xa3   :  { %v166_v55 = vadd.f32 1.0, %v508_v53  ;;  %v122_v63 = vsub.f32 0.0, %v121_v59  ;;  %v364_v0 = vpop.xlane.xlu1 %363 }
  0xa4   :  { %v510_v58 = vpop.eup %509  ;;  %v764_v1 = vmul.f32 %v761_v60, %v364_v0 }
  0xa5   :  { %513 = vlog2.f32 %v166_v55  ;;  %v83_v61 = vadd.f32 1.0, %v510_v58  ;;  %v123_v2 = vmul.f32 1.442695, %v122_v63  ;;  %v512_v5 = vpop.eup %511 }
  0xa6   :  { %515 = vpow2.f32 %v287_v56  ;;  %v367_v4 = vand.u32 2147483647, %v764_v1  ;;  %v323_v6 = vpop.xlane.xlu0 %322  ;;  %v248_v19 = vadd.f32 1.0, %v512_v5  ;;  %v366_v5 = vmin.f32 %v764_v1, 0.0 }
  0xa7   :  { %517 = vlog2.f32 %v83_v61  ;;  %v773_v9 = vmul.f32 %v769_v3, %v323_v6 }
  0xa8   :  { %519 = vpow2.f32 %v205_v62  ;;  %v368_v8 = vsub.f32 0.0, %v367_v4 }
  0xa9   :  { %521 = vpow2.f32 %v123_v2  ;;  %v326_v17 = vand.u32 2147483647, %v773_v9  ;;  %v325_v48 = vmin.f32 %v773_v9, 0.0 }
  0xaa   :  { %v369_v16 = vmul.f32 1.442695, %v368_v8 }
  0xab   :  { %v514_v7 = vpop.eup %513  ;;  %v327_v23 = vsub.f32 0.0, %v326_v17 }
  0xac   :  { %v516_v10 = vpop.eup %515  ;;  %v168_v12 = vmul.f32 0.6931472, %v514_v7 }
  0xad   :  { %v518_v13 = vpop.eup %517  ;;  %v289_v15 = vadd.f32 1.0, %v516_v10  ;;  %v328_v32 = vmul.f32 1.442695, %v327_v23 }
  0xae   :  { %v520_v18 = vpop.eup %519  ;;  %v169_v20 = vsub.f32 %v161_v11, %v168_v12  ;;  %v85_v21 = vmul.f32 0.6931472, %v518_v13 }
  0xaf   :  { %523 = vlog2.f32 %v289_v15  ;;  %v207_v22 = vadd.f32 1.0, %v520_v18  ;;  %v522_v25 = vpop.eup %521 }
  0xb0   :  { %525 = vpow2.f32 %v369_v16  ;;  %v171_v27 = vsel %vm170_vm0, %v169_v20, 0.0  ;;  %v86_v30 = vsub.f32 %v78_v14, %v85_v21  ;;  %v125_v31 = vadd.f32 1.0, %v522_v25 }
  0xb1   :  { %527 = vlog2.f32 %v207_v22  ;;  %v172_v33 = vsel %vm89_vm1, %v171_v27, 0.0 }
  0xb2   :  { %529 = vlog2.f32 %v248_v19  ;;  %173 = vadd.xlane.f32.xlu1 %v172_v33  ;;  %v88_v34 = vsel %vm87_vm2, %v86_v30, 0.0 }
  0xb3   :  { %531 = vlog2.f32 %v125_v31  ;;  %v90_v35 = vsel %vm89_vm1, %v88_v34, 0.0 }
  0xb4   :  { %533 = vpow2.f32 %v328_v32  ;;  %91 = vadd.xlane.f32.xlu2 %v90_v35 }
  0xb5   :  { %v524_v28 = vpop.eup %523 }
  0xb6   :  { %v526_v36 = vpop.eup %525  ;;  %v291_v26 = vmul.f32 0.6931472, %v524_v28 }
  0xb7   :  { %v528_v38 = vpop.eup %527  ;;  %v371_v40 = vadd.f32 1.0, %v526_v36 }
  0xb8   :  { %v530_v41 = vpop.eup %529  ;;  %v292_v45 = vsub.f32 %v284_v37, %v291_v26  ;;  %v209_v46 = vmul.f32 0.6931472, %v528_v38 }
  0xb9   :  { %v532_v49 = vpop.eup %531  ;;  %535 = vlog2.f32 %v371_v40  ;;  %v250_v57 = vmul.f32 0.6931472, %v530_v41 }
  0xba   :  { %v534_v50 = vpop.eup %533  ;;  %v294_v52 = vsel %vm293_vm3, %v292_v45, 0.0  ;;  %v210_v53 = vsub.f32 %v202_v42, %v209_v46  ;;  %v127_v55 = vmul.f32 0.6931472, %v532_v49 }
  0xbb   :  { %v330_v44 = vadd.f32 1.0, %v534_v50  ;;  %v295_v56 = vsel %vm89_vm1, %v294_v52, 0.0  ;;  %v251_v61 = vsub.f32 %v243_v43, %v250_v57 }
  0xbc   :  { %296 = vadd.xlane.f32.xlu1 %v295_v56  ;;  %v212_v39 = vsel %vm211_vm4, %v210_v53, 0.0  ;;  %v128_v47 = vsub.f32 %v120_v51, %v127_v55 }
  0xbd   :  { %537 = vlog2.f32 %v330_v44  ;;  %v213_v58 = vsel %vm89_vm1, %v212_v39, 0.0  ;;  %v253_v0 = vsel %vm252_vm6, %v251_v61, 0.0 }
  0xbe   :  { %214 = vadd.xlane.f32.xlu2 %v213_v58  ;;  %v130_v54 = vsel %vm129_vm5, %v128_v47, 0.0  ;;  %v254_v6 = vsel %vm89_vm1, %v253_v0, 0.0 }
  0xbf   :  { %v131_v59 = vsel %vm89_vm1, %v130_v54, 0.0  ;;  %v536_v62 = vpop.eup %535 }
  0xc0   :  { %132 = vadd.xlane.f32.xlu0 %v131_v59  ;;  %v373_v4 = vmul.f32 0.6931472, %v536_v62 }
  0xc2   :  { %v374_v8 = vsub.f32 %v366_v5, %v373_v4 }
  0xc3   :  { %v538_v63 = vpop.eup %537 }
  0xc4   :  { %v332_v2 = vmul.f32 0.6931472, %v538_v63  ;;  %v376_v24 = vsel %vm375_vm8, %v374_v8, 0.0 }
  0xc5   :  { %v377_v9 = vsel %vm89_vm1, %v376_v24, 0.0 }
  0xc6   :  { %v333_v29 = vsub.f32 %v325_v48, %v332_v2 }
  0xc8   :  { %255 = vadd.xlane.f32.xlu0 %v254_v6  ;;  %v335_v7 = vsel %vm334_vm7, %v333_v29, 0.0 }
  0xc9   :  { %v336_v10 = vsel %vm89_vm1, %v335_v7, 0.0 }
  0xca   :  { %337 = vadd.xlane.f32.xlu2 %v336_v10 }
  0xd0   :  { %378 = vadd.xlane.f32.xlu0 %v377_v9 }
 0x125   :  { %v174_v11 = vpop.xlane.xlu1 %173 }
 0x126   :  { %v175_v1 = vrot.slane %v174_v11, 4 }
 0x127   :  { %v92_v12 = vpop.xlane.xlu2 %91 }
 0x128   :  { %v93_v3 = vrot.slane %v92_v12, 4  ;;  %v176_v16 = vadd.f32 %v175_v1, %v174_v11 }
 0x12a   :  { %v94_v13 = vadd.f32 %v93_v3, %v92_v12  ;;  %v177_v22 = vrot.slane %v176_v16, 2 }
 0x12c   :  { %v95_v14 = vrot.slane %v94_v13, 2  ;;  %v178_v33 = vadd.f32 %v177_v22, %v176_v16 }
 0x12e   :  { %v96_v15 = vadd.f32 %v95_v14, %v94_v13  ;;  %v179_v38 = vrot.slane %v178_v33, 1 }
 0x12f   :  { %v297_v17 = vpop.xlane.xlu1 %296 }
 0x130   :  { %v97_v18 = vrot.slane %v96_v15, 1  ;;  %v298_v60 = vrot.slane %v297_v17, 4  ;;  %v180_v52 = vadd.f32 %v179_v38, %v178_v33 }
 0x131   :  { %v215_v19 = vpop.xlane.xlu2 %214 }
 0x132   :  { %v216_v20 = vrot.slane %v215_v19, 4  ;;  %v98_v21 = vadd.f32 %v97_v18, %v96_v15  ;;  %v299_v32 = vadd.f32 %v298_v60, %v297_v17 }
 0x133   :  { %v133_v23 = vpop.xlane.xlu0 %132 }
 0x134   :  { %v217_v25 = vadd.f32 %v216_v20, %v215_v19  ;;  %v134_v27 = vrot.slane %v133_v23, 4  ;;  %477 = vpush %v98_v21  ;;  %v300_v37 = vrot.slane %v299_v32, 2 }
 0x136   :  { %v218_v30 = vrot.slane %v217_v25, 2  ;;  %v135_v31 = vadd.f32 %v134_v27, %v133_v23  ;;  %v301_v51 = vadd.f32 %v300_v37, %v299_v32 }
 0x138   :  { %v136_v34 = vrot.slane %v135_v31, 2  ;;  %v219_v35 = vadd.f32 %v218_v30, %v217_v25  ;;  %v302_v47 = vrot.slane %v301_v51, 1 }
 0x13a   :  { %v137_v28 = vadd.f32 %v136_v34, %v135_v31  ;;  %v220_v36 = vrot.slane %v219_v35, 1  ;;  %v303_v62 = vadd.f32 %v302_v47, %v301_v51 }
 0x13b   :  { %v256_v26 = vpop.xlane.xlu0 %255 }
 0x13c   :  { %v257_v40 = vrot.slane %v256_v26, 4  ;;  %v138_v41 = vrot.slane %v137_v28, 1  ;;  %v221_v50 = vadd.f32 %v220_v36, %v219_v35 }
 0x13d   :  { %v338_v42 = vpop.xlane.xlu2 %337 }
 0x13e   :  { %v339_v45 = vrot.slane %v338_v42, 4  ;;  %v258_v46 = vadd.f32 %v257_v40, %v256_v26  ;;  %v139_v49 = vadd.f32 %v138_v41, %v137_v28 }
 0x140   :  { %v340_v53 = vadd.f32 %v339_v45, %v338_v42  ;;  %v259_v55 = vrot.slane %v258_v46, 2  ;;  %479 = vpush %v139_v49 }
 0x141   :  { %481 = vpush %v180_v52 }
 0x142   :  { %v341_v44 = vrot.slane %v340_v53, 2  ;;  %483 = vpush %v221_v50  ;;  %v260_v56 = vadd.f32 %v259_v55, %v258_v46 }
 0x143   :  { %v379_v39 = vpop.xlane.xlu0 %378 }
 0x144   :  { %v342_v57 = vadd.f32 %v341_v44, %v340_v53  ;;  %v380_v58 = vrot.slane %v379_v39, 4  ;;  %v261_v43 = vrot.slane %v260_v56, 1 }
 0x146   :  { %v381_v54 = vadd.f32 %v380_v58, %v379_v39  ;;  %v262_v59 = vadd.f32 %v261_v43, %v260_v56  ;;  %v343_v61 = vrot.slane %v342_v57, 1 }
 0x148   :  { %v382_v63 = vrot.slane %v381_v54, 2  ;;  %485 = vpush %v262_v59  ;;  %v344_v48 = vadd.f32 %v343_v61, %v342_v57 }
 0x149   :  { %487 = vpush %v303_v62 }
 0x14a   :  { %v383_v0 = vadd.f32 %v382_v63, %v381_v54  ;;  %489 = vpush %v344_v48 }
 0x14c   :  { %v384_v2 = vrot.slane %v383_v0, 1 }
 0x14e   :  { %v385_v4 = vadd.f32 %v384_v2, %v383_v0 }
 0x150   :  { %491 = vpush %v385_v4 }
 0x165   :  { %s478_s2 = spop %477 }
 0x166   :  { %v100_v5 = vstv %s478_s2 }
 0x167   :  { %v101_v6 = vmul.f32 1.442695, %v100_v5 }
 0x171   :  { %s480_s20 = spop %479 }
 0x172   :  { %v141_v29 = vstv %s480_s20  ;;  %s482_s21 = spop %481 }
 0x173   :  { %v142_v7 = vmul.f32 1.442695, %v141_v29  ;;  %v182_v8 = vstv %s482_s21  ;;  %s484_s22 = spop %483 }
 0x174   :  { %v183_v10 = vmul.f32 1.442695, %v182_v8  ;;  %v223_v24 = vstv %s484_s22 }
 0x175   :  { %539 = vpow2.f32 %v142_v7  ;;  %v224_v9 = vmul.f32 1.442695, %v223_v24 }
 0x176   :  { %541 = vpow2.f32 %v101_v6 }
 0x177   :  { %543 = vpow2.f32 %v183_v10 }
 0x178   :  { %545 = vpow2.f32 %v224_v9 }
 0x179   :  { %s486_s23 = spop %485 }
 0x17a   :  { %v264_v11 = vstv %s486_s23  ;;  %s488_s24 = spop %487 }
 0x17b   :  { %v540_v12 = vpop.eup %539  ;;  %v265_v3 = vmul.f32 1.442695, %v264_v11  ;;  %v305_v13 = vstv %s488_s24  ;;  %s490_s25 = spop %489 }
 0x17c   :  { %v306_v1 = vmul.f32 1.442695, %v305_v13  ;;  %v542_v14 = vpop.eup %541  ;;  %v346_v15 = vstv %s490_s25 }
 0x17d   :  { %547 = vpow2.f32 %v265_v3  ;;  %v544_v16 = vpop.eup %543  ;;  %v391_v17 = vsel %vm390_vm9, %v542_v14, %v540_v12  ;;  %v347_v18 = vmul.f32 1.442695, %v346_v15 }
 0x17e   :  { %549 = vpow2.f32 %v306_v1  ;;  %v393_v19 = vsel %vm392_vm10, %v391_v17, %v544_v16  ;;  %v546_v20 = vpop.eup %545 }
 0x17f   :  { %551 = vpow2.f32 %v347_v18  ;;  %v395_v23 = vsel %vm394_vm11, %v393_v19, %v546_v20 }
 0x181   :  { %s492_s26 = spop %491 }
 0x182   :  { %v387_v21 = vstv %s492_s26 }
 0x183   :  { %v548_v22 = vpop.eup %547  ;;  %v388_v60 = vmul.f32 1.442695, %v387_v21 }
 0x184   :  { %v550_v25 = vpop.eup %549  ;;  %v397_v27 = vsel %vm396_vm12, %v395_v23, %v548_v22 }
 0x185   :  { %553 = vpow2.f32 %v388_v60  ;;  %v399_v30 = vsel %vm398_vm13, %v397_v27, %v550_v25  ;;  %v552_v31 = vpop.eup %551 }
 0x186   :  { %v401_v33 = vsel %vm400_vm14, %v399_v30, %v552_v31 }
 0x18b   :  { %v554_v32 = vpop.eup %553 }
 0x18c   :  { %v403_v34 = vsel %vm402_vm15, %v401_v33, %v554_v32 }
 0x18d   :  { %404 = vst [vmem:[#allocation9] sm:$0xff] %v403_v34 }
 0x18e   :  { %415 = dma.vmem_to_hbm [thread:$0]  %s411_s28, 128, %s413_s6, [#allocation4]  }
 0x18f   :  { %633 = dma.done.wait [#allocation4], 128  }
 0x190   :  { %634 = vsyncadd [#allocation4], 4294967168 }
 0x191   :  { %420 = vsyncpa [#allocation3], 1 }
 0x192   :  { %421 = vsyncpa [#allocation4], 1 }
 0x193   :  { %422 = vsyncpa [#allocation5], 1 }
 0x194   :  { %423 = vsyncpa [#allocation7], 1 }

</bundles_post_ra>
